<compile_context>
chip_gen: v7x
topology: tpu7x:2x2x1
jax: 0.10.0
libtpu: 0.0.40
codegen_flags: <defaults>
</compile_context>

<pallas_src>
import jax
import jax.numpy as jnp
from jax import lax
from jax.experimental import pallas as pl
from jax.experimental.pallas import tpu as pltpu


def _round_up(x, m):
    return (x + m - 1) // m * m


# ---------------------------------------------------------------------------
# Per-generation tiling / VMEM policy (decided once at import time)
# ---------------------------------------------------------------------------

def _hw_config():
    kind = ""
    try:
        kind = jax.devices()[0].device_kind.lower()
    except Exception:
        pass
    if "7x" in kind or "v7" in kind:
        # 64 MiB physical VMEM, 2 TensorCores: smaller tiles, keep >=8 parallel blocks.
        return {"vmem_limit": 44 * 2**20, "tile_budget": 24 * 2**20, "min_blocks": 8}
    if "v5" in kind or "v6" in kind:
        # 128 MiB physical VMEM, 1 TensorCore: go big on tiles.
        return {"vmem_limit": 100 * 2**20, "tile_budget": 64 * 2**20, "min_blocks": 2}
    # Unknown chip: conservative.
    return {"vmem_limit": 48 * 2**20, "tile_budget": 24 * 2**20, "min_blocks": 4}


_HW = _hw_config()


# ---------------------------------------------------------------------------
# Pallas kernel: out^T = W^T @ patches^T + b  (single K tile, fused bias)
# ---------------------------------------------------------------------------

def _matmul_bias_t_kernel(w_ref, p_ref, b_ref, o_ref):
    """w_ref: (Coutp, Kp)  p_ref: (Kp, tM)  b_ref: (Coutp, 1)  o_ref: (Coutp, tM).

    K is a single tile -> one dot + fused bias epilogue, no scratch accumulator
    and no pl.when init/finalize passes.  M (big spatial axis) is on the output
    lane dimension -> wide unmasked stores.
    """
    acc = lax.dot_general(
        w_ref[...], p_ref[...],
        dimension_numbers=(((1,), (0,)), ((), ())),
        preferred_element_type=jnp.float32)
    o_ref[...] = acc + b_ref[...]


def _pick_tm(Mp, Kp, Coutp, operand_bytes, n_batch):
    """Largest lane-dense M tile that fits the VMEM budget, divides Mp, and
    leaves enough parallel blocks for multi-TensorCore chips."""
    budget = _HW["tile_budget"]
    fixed = 2 * Coutp * Kp * operand_bytes + 2 * Coutp * 4          # wT + bias (dbl-buffered)
    per_tm = 2 * Kp * operand_bytes + 2 * Coutp * 4                 # patches + out per column
    cap = max(128, (budget - fixed) // per_tm)
    cap = max(128, (cap // 128) * 128)
    tm = min(Mp, cap)
    while Mp % tm != 0:                                             # Mp is a multiple of 128
        tm -= 128
    while (n_batch * (Mp // tm) < _HW["min_blocks"] and tm > 128
           and tm % 256 == 0 and Mp % (tm // 2) == 0):
        tm //= 2
    return tm


def _phase_matmul(wT, patches, bias2d, *, tm):
    """patches: (N, Kp, Mp), wT: (Coutp, Kp), bias2d: (Coutp, 1) -> (N, Coutp, Mp) f32."""
    nb, Kp, Mp = patches.shape
    Coutp = wT.shape[0]
    grid = (nb, Mp // tm)
    flops = 2 * nb * Coutp * Kp * Mp
    bytes_accessed = (patches.size * patches.dtype.itemsize
                      + wT.size * wT.dtype.itemsize
                      + bias2d.size * 4
                      + nb * Coutp * Mp * 4)
    return pl.pallas_call(
        _matmul_bias_t_kernel,
        out_shape=jax.ShapeDtypeStruct((nb, Coutp, Mp), jnp.float32),
        grid=grid,
        in_specs=[
            pl.BlockSpec((Coutp, Kp), lambda n, m: (0, 0)),
            pl.BlockSpec((None, Kp, tm), lambda n, m: (n, 0, m)),
            pl.BlockSpec((Coutp, 1), lambda n, m: (0, 0)),
        ],
        out_specs=pl.BlockSpec((None, Coutp, tm), lambda n, m: (n, 0, m)),
        compiler_params=pltpu.CompilerParams(
            dimension_semantics=("parallel", "parallel"),
            vmem_limit_bytes=_HW["vmem_limit"]),
        cost_estimate=pl.CostEstimate(flops=flops, transcendentals=0,
                                      bytes_accessed=bytes_accessed),
    )(wT, patches, bias2d)


# ---------------------------------------------------------------------------
# AddCoordinates (y, x[, r]) in NCHW — layout glue, fused by XLA under jit
# ---------------------------------------------------------------------------

def _add_coordinates_nchw(x, with_r):
    """Prepend (y, x[, r]) channels.  x: (N, C, H, W)."""
    N, C, H, W = x.shape
    dt = x.dtype
    ys = (2.0 * jnp.arange(H, dtype=dt) / (H - 1.0) - 1.0) if H > 1 else jnp.zeros((H,), dt)
    xs = (2.0 * jnp.arange(W, dtype=dt) / (W - 1.0) - 1.0) if W > 1 else jnp.zeros((W,), dt)
    yg = jnp.broadcast_to(ys[:, None], (H, W))
    xg = jnp.broadcast_to(xs[None, :], (H, W))
    chans = [yg, xg]
    if with_r:
        r = jnp.sqrt(yg * yg + xg * xg)
        r = r / jnp.maximum(jnp.max(r), jnp.asarray(1e-12, dt))   # guard H==W==1
        chans.append(r)
    coords = jnp.stack(chans, axis=0)                              # (2 or 3, H, W)
    coords = jnp.broadcast_to(coords[None], (N, len(chans), H, W))
    return jnp.concatenate([coords, x], axis=1)


# ---------------------------------------------------------------------------
# Sub-pixel phase decomposition of ConvTranspose2d
# ---------------------------------------------------------------------------
# out[o] = sum_{k} x[i] * w[k]  where  i*s + k*d = o + p.
# Phase ph = (o + p) mod s; only taps with (k*d) mod s == ph contribute, each
# with integer offset m_k = (k*d - ph)/s, and o = q*s + ph - p, i = q - m_k.

def _phase_axis_plan(K, d, s, p, out_size):
    plans = []
    for ph in range(s):
        taps = [k for k in range(K) if (k * d) % s == ph]
        ms = [(k * d - ph) // s for k in taps]
        q_min = -((ph - p) // s)                      # ceil((p - ph) / s)
        q_max = (out_size - 1 + p - ph) // s
        n_q = q_max - q_min + 1
        o0 = q_min * s + ph - p
        plans.append({"taps": taps, "ms": ms, "q_min": q_min, "n_q": n_q, "o0": o0})
    return plans


def _axis_pads(plans, in_size):
    pad_l, pad_r = 0, 0
    for pln in plans:
        if not pln["taps"] or pln["n_q"] <= 0:
            continue
        pad_l = max(pad_l, max(pln["ms"]) - pln["q_min"])
        pad_r = max(pad_r, pln["q_min"] + pln["n_q"] - 1 - min(pln["ms"]) - (in_size - 1))
    return max(pad_l, 0), max(pad_r, 0)


# ---------------------------------------------------------------------------
# CoordConvTranspose forward
# ---------------------------------------------------------------------------

def _coord_conv_transpose_impl(x, weight, bias, *, stride, padding,
                               output_padding, dilation, with_r, use_bf16):
    """x: (N, Cin, H, W).  weight: (Cin+coords, Cout, KH, KW) (PyTorch
    ConvTranspose2d layout).  bias: (Cout,).  Returns (N, Cout, Hout, Wout)."""
    N, Cin, H, W = x.shape
    CinT, Cout, KH, KW = weight.shape
    s, p, op, d = stride, padding, output_padding, dilation
    if not (op < s or op < d):
        raise ValueError("output_padding must be smaller than stride or dilation")

    if bias is None:
        bias = jnp.zeros((Cout,), jnp.float32)

    Hout = (H - 1) * s - 2 * p + d * (KH - 1) + op + 1
    Wout = (W - 1) * s - 2 * p + d * (KW - 1) + op + 1

    cdt = jnp.bfloat16 if use_bf16 else jnp.float32
    ob = 2 if use_bf16 else 4

    # ---- AddCoordinates (NCHW throughout; channels sit on the K axis) -----
    xa = _add_coordinates_nchw(x.astype(jnp.float32), with_r)
    assert xa.shape[1] == CinT, (xa.shape, CinT)
    xa = xa.astype(cdt)

    plans_h = _phase_axis_plan(KH, d, s, p, Hout)
    plans_w = _phase_axis_plan(KW, d, s, p, Wout)
    padl_h, padr_h = _axis_pads(plans_h, H)
    padl_w, padr_w = _axis_pads(plans_w, W)
    xp = jnp.pad(xa, ((0, 0), (0, 0), (padl_h, padr_h), (padl_w, padr_w)))

    Coutp = _round_up(Cout, 16)                    # sublane padding only
    bias_f32 = bias.astype(jnp.float32)
    b2 = jnp.pad(bias_f32, (0, Coutp - Cout)).reshape(Coutp, 1)

    out = jnp.zeros((N, Cout, Hout, Wout), jnp.float32)
    for ph in plans_h:
        for pw in plans_w:
            n_qh, n_qw = ph["n_q"], pw["n_q"]
            if n_qh <= 0 or n_qw <= 0:
                continue
            row_sl = slice(ph["o0"], ph["o0"] + (n_qh - 1) * s + 1, s)
            col_sl = slice(pw["o0"], pw["o0"] + (n_qw - 1) * s + 1, s)

            if not ph["taps"] or not pw["taps"]:
                # No kernel tap hits this phase (e.g. gcd(d, s) > 1): bias only.
                po = jnp.broadcast_to(bias_f32[None, :, None, None],
                                      (N, Cout, n_qh, n_qw))
                out = out.at[:, :, row_sl, col_sl].set(po)
                continue

            # --- per-phase im2col, channel-major (K on the sublane axis) ---
            pieces = []
            for mh in ph["ms"]:
                r0 = ph["q_min"] - mh + padl_h
                for mw in pw["ms"]:
                    c0 = pw["q_min"] - mw + padl_w
                    pieces.append(lax.slice(
                        xp, (0, 0, r0, c0), (N, CinT, r0 + n_qh, c0 + n_qw)))
            Kph = len(pieces) * CinT
            Kp = _round_up(Kph, 128)
            M = n_qh * n_qw
            Mp = _round_up(M, 128)
            if Kp > Kph:        # fold K padding into the concat (no extra pad pass)
                pieces.append(jnp.zeros((N, Kp - Kph, n_qh, n_qw), cdt))
            pt = jnp.concatenate(pieces, axis=1).reshape(N, Kp, M)
            if Mp > M:
                pt = jnp.pad(pt, ((0, 0), (0, 0), (0, Mp - M)))

            # --- per-phase sub-kernel, transposed: (Coutp, Kp) -------------
            w_sub = weight[:, :, ph["taps"], :][:, :, :, pw["taps"]]   # (CinT,Cout,th,tw)
            wT = jnp.transpose(w_sub, (1, 2, 3, 0)).reshape(Cout, Kph)  # K = (kh,kw,cin)
            wT = jnp.pad(wT, ((0, Coutp - Cout), (0, Kp - Kph))).astype(cdt)

            tm = _pick_tm(Mp, Kp, Coutp, ob, N)
            o = _phase_matmul(wT, pt, b2, tm=tm)                 # (N, Coutp, Mp) f32
            po = o[:, :Cout, :M].reshape(N, Cout, n_qh, n_qw)
            out = out.at[:, :, row_sl, col_sl].set(po)

    return out.astype(x.dtype)


_coord_conv_transpose_jit = jax.jit(
    _coord_conv_transpose_impl,
    static_argnames=("stride", "padding", "output_padding", "dilation",
                     "with_r", "use_bf16"))


def coord_conv_transpose(x, weight, bias, *, stride=1, padding=0,
                         output_padding=0, dilation=1, with_r=False,
                         use_bf16=True):
    return _coord_conv_transpose_jit(
        x, weight, bias, stride=stride, padding=padding,
        output_padding=output_padding, dilation=dilation, with_r=with_r,
        use_bf16=use_bf16)


def init_coord_conv_transpose_params(key, in_channels, out_channels, kernel_size, with_r):
    """Deterministic random init matching nn.ConvTranspose2d's layout."""
    cin_total = in_channels + (3 if with_r else 2)
    kw_, kb_ = jax.random.split(key)
    fan_in = cin_total * kernel_size * kernel_size
    bound = 1.0 / (fan_in ** 0.5)
    weight = jax.random.uniform(
        kw_, (cin_total, out_channels, kernel_size, kernel_size),
        jnp.float32, -bound, bound)
    bias = jax.random.uniform(kb_, (out_channels,), jnp.float32, -bound, bound)
    return weight, bias


# ---------------------------------------------------------------------------
# Independent (scatter-formulation) reference for verification
# ---------------------------------------------------------------------------

def _reference_conv_transpose(x_nchw, weight, bias, *, stride, padding,
                              output_padding, dilation):
    N, Cin, H, W = x_nchw.shape
    _, Cout, KH, KW = weight.shape
    s, p, op, d = stride, padding, output_padding, dilation
    Hout = (H - 1) * s - 2 * p + d * (KH - 1) + op + 1
    Wout = (W - 1) * s - 2 * p + d * (KW - 1) + op + 1
    Hfull = (H - 1) * s + d * (KH - 1) + 1 + op
    Wfull = (W - 1) * s + d * (KW - 1) + 1 + op
    out = jnp.zeros((N, Cout, Hfull, Wfull), jnp.float32)
    for kh in range(KH):
        for kw in range(KW):
            contrib = jnp.einsum("nchw,cd->ndhw", x_nchw, weight[:, :, kh, kw])
            out = out.at[:, :,
                         kh * d: kh * d + (H - 1) * s + 1: s,
                         kw * d: kw * d + (W - 1) * s + 1: s].add(contrib)
    out = out[:, :, p:p + Hout, p:p + Wout]
    return out + bias[None, :, None, None]


# ---------------------------------------------------------------------------

if __name__ == "__main__":
    key = jax.random.PRNGKey(0)
    kx, kp = jax.random.split(key)

    # CoordConvTranspose(in_channels=4, out_channels=16, kernel_size=3,
    #                    stride=2, padding=1, output_padding=1, with_r=True)
    N, Cin, H, W = 2, 4, 16, 16
    Cout, Ksz = 16, 3
    stride, padding, output_padding, dilation, with_r = 2, 1, 1, 1, True

    x = jax.random.normal(kx, (N, Cin, H, W), jnp.float32)
    weight, bias = init_coord_conv_transpose_params(kp, Cin, Cout, Ksz, with_r)

    Hout = (H - 1) * stride - 2 * padding + dilation * (Ksz - 1) + output_padding + 1
    Wout = (W - 1) * stride - 2 * padding + dilation * (Ksz - 1) + output_padding + 1

    # Fast path: bf16 MXU operands, f32 accumulate.
    out = coord_conv_transpose(
        x, weight, bias, stride=stride, padding=padding,
        output_padding=output_padding, dilation=dilation, with_r=with_r,
        use_bf16=True)
    out = jax.block_until_ready(out)
    assert out.shape == (N, Cout, Hout, Wout), out.shape
    assert bool(jnp.isfinite(out).all())

    # Independent scatter-formulation JAX reference (f32).
    x_aug = _add_coordinates_nchw(x, with_r)
    ref = _reference_conv_transpose(
        x_aug, weight, bias, stride=stride, padding=padding,
        output_padding=output_padding, dilation=dilation)

    # Exact-path check (f32 operands) at tight tolerance.
    out32 = coord_conv_transpose(
        x, weight, bias, stride=stride, padding=padding,
        output_padding=output_padding, dilation=dilation, with_r=with_r,
        use_bf16=False)
    out32 = jax.block_until_ready(out32)
    err32 = float(jnp.max(jnp.abs(out32 - ref)))
    assert bool(jnp.allclose(out32, ref, atol=1e-3, rtol=1e-3)), err32

    # bf16 fast path at bf16-appropriate tolerance (operands rounded to bf16).
    err16 = float(jnp.max(jnp.abs(out - ref)))
    assert bool(jnp.allclose(out, ref, atol=8e-2, rtol=2e-2)), err16

    print("KERNEL_OK")
</pallas_src>

<mosaic_0001>
module attributes {stable_mosaic.version = 11 : i64} {
  func.func @_matmul_bias_t_kernel(%arg0: i32, %arg1: i32, %arg2: memref<16x128xbf16, #tpu.memory_space<vmem>>, %arg3: memref<1x128x128xbf16, #tpu.memory_space<vmem>>, %arg4: memref<16x1xf32, #tpu.memory_space<vmem>>, %arg5: memref<1x16x128xf32, #tpu.memory_space<vmem>>) attributes {dimension_semantics = [#tpu.dimension_semantics<parallel>, #tpu.dimension_semantics<parallel>], iteration_bounds = array<i64: 2, 2>, scalar_prefetch = 0 : i64, scratch_operands = 0 : i64, tpu.core_type = #tpu.core_type<tc>, window_params = [{pipeline_mode = #tpu.pipeline_mode<synchronous>, transform_indices = @transform_0, window_bounds = array<i64: 16, 128>}, {transform_indices = @transform_1, window_bounds = array<i64: 1, 128, 128>}, {pipeline_mode = #tpu.pipeline_mode<synchronous>, transform_indices = @transform_2, window_bounds = array<i64: 16, 1>}, {transform_indices = @transform_3, window_bounds = array<i64: 1, 16, 128>}]} {
    %c0 = arith.constant 0 : index
    %c0_0 = arith.constant 0 : index
    %0 = vector.load %arg2[%c0, %c0_0] : memref<16x128xbf16, #tpu.memory_space<vmem>>, vector<16x128xbf16>
    %c0_1 = arith.constant 0 : index
    %c0_2 = arith.constant 0 : index
    %c0_3 = arith.constant 0 : index
    %1 = vector.load %arg3[%c0_1, %c0_2, %c0_3] : memref<1x128x128xbf16, #tpu.memory_space<vmem>>, vector<1x128x128xbf16>
    %2 = vector.shape_cast %1 : vector<1x128x128xbf16> to vector<128x128xbf16>
    %cst = arith.constant dense<0.000000e+00> : vector<16x128xf32>
    %3 = tpu.matmul %0, %2, %cst {dimension_numbers = #tpu.dot_dimension_numbers<[1], [0], [0], [1], [0, 0, 1, 1], [], []>} : vector<16x128xbf16>, vector<128x128xbf16>, vector<16x128xf32> -> vector<16x128xf32>
    %c0_4 = arith.constant 0 : index
    %c0_5 = arith.constant 0 : index
    %4 = vector.load %arg4[%c0_4, %c0_5] : memref<16x1xf32, #tpu.memory_space<vmem>>, vector<16x1xf32>
    %5 = vector.broadcast %4 : vector<16x1xf32> to vector<16x128xf32>
    %6 = arith.addf %3, %5 : vector<16x128xf32>
    %c0_6 = arith.constant 0 : index
    %c0_7 = arith.constant 0 : index
    %c0_8 = arith.constant 0 : index
    %7 = vector.load %arg5[%c0_6, %c0_7, %c0_8] : memref<1x16x128xf32, #tpu.memory_space<vmem>>, vector<1x16x128xf32>
    %8 = vector.shape_cast %7 : vector<1x16x128xf32> to vector<16x128xf32>
    %9 = vector.shape_cast %6 : vector<16x128xf32> to vector<1x16x128xf32>
    tpu.vector_store %arg5[%c0_6, %c0_7, %c0_8], %9 {strides = array<i32>} : memref<1x16x128xf32, #tpu.memory_space<vmem>>, vector<1x16x128xf32>,
    return
  }
  func.func @transform_0(%arg0: i32, %arg1: i32) -> (i32, i32) {
    %c0_i32 = arith.constant 0 : i32
    %c0_i32_0 = arith.constant 0 : i32
    %c0_i32_1 = arith.constant 0 : i32
    return %c0_i32, %c0_i32_0 : i32, i32
  }
  func.func @transform_1(%arg0: i32, %arg1: i32) -> (i32, i32, i32) {
    %c0_i32 = arith.constant 0 : i32
    %c0_i32_0 = arith.constant 0 : i32
    return %arg0, %c0_i32, %arg1 : i32, i32, i32
  }
  func.func @transform_2(%arg0: i32, %arg1: i32) -> (i32, i32) {
    %c0_i32 = arith.constant 0 : i32
    %c0_i32_0 = arith.constant 0 : i32
    %c0_i32_1 = arith.constant 0 : i32
    return %c0_i32, %c0_i32_0 : i32, i32
  }
  func.func @transform_3(%arg0: i32, %arg1: i32) -> (i32, i32, i32) {
    %c0_i32 = arith.constant 0 : i32
    %c0_i32_0 = arith.constant 0 : i32
    return %arg0, %c0_i32, %arg1 : i32, i32, i32
  }
}

</mosaic_0001>

<bundles_post_ra>
// kernel: _coord_conv_transpose_impl.4
= control target key start
LH: loop header
LB: loop body
LE: loop exit
PB: predicated region body
PF: predicated region fallthrough
CT: control target
= control target key end

     0   :  { %s732_s12 = smov 0   ;;  %s734_s13 = smov 0   ;;  %s859_s0 = inlined_call_operand.vmem [shape: bf16[16,128], index: 0, kind: input, shape index: {}]   ;;  %s860_s1 = inlined_call_operand.vmem [shape: bf16[2,128,256], index: 1, kind: input, shape index: {}]   ;;  %s861_s2 = inlined_call_operand.vmem [shape: f32[16,1], index: 2, kind: input, shape index: {}]   ;;  %s862_s3 = inlined_call_operand.vmem [shape: f32[2,16,256], index: 3, kind: output, shape index: {}]  }
   0x1   :  { %s736_s14 = smov 0   ;;  %s738_s15 = smov 0  }
   0x2   :  { %s740_s16 = smov 0   ;;  %s742_s17 = smov 0  }
   0x3   :  { %s744_s18 = smov 0  }
   0x4 LB: > { %s22_s19 = sadd.s32 1, %s699_s16  ;;  %s25_s20 = sadd.s32 1, %s703_s17  ;;  %s707_s18 = sphi %s744_s18, %s13_s18   ;;  %s703_s17 = sphi %s742_s17, %s869_s17   ;;  %s699_s16 = sphi %s740_s16, %s868_s16   ;;  %s695_s15 = sphi %s738_s15, %s867_s15   ;;  %s691_s14 = sphi %s736_s14, %s866_s14   ;;  %s687_s13 = sphi %s734_s13, %s865_s13   ;;  %s683_s12 = sphi %s732_s12, %s864_s12  }
   0x5   : > { %p23_p0 = scmp.ge.s32.totalorder %s22_s19, 2  ;;  %s531_s21 = sadd.s32 4294967295, %s707_s18  }
   0x6   : > { %p62_p1 = scmp.ne.s32.totalorder %s687_s13, %s683_s12  ;;  %p63_p2 = scmp.eq.s32.totalorder %s707_s18, 0 }
   0x7   : > { %s871_s19 = smov (%p23_p0, %s22_s19), 0  ;;  %s873_s20 = smov (!%p23_p0, %s25_s20), %s703_s17 }
   0x8   : > { %p27_p3 = scmp.ge.s32.totalorder %s873_s20, 2  ;;  %p115_p4 = scmp.eq.s32.totalorder %s531_s21, 3 }
   0x9   : > { %s51_s22 = ssub.s32 %s699_s16, %s871_s19  ;;  %p64_p5 = por %p63_p2, %p62_p1 }
   0xa   : > { %s875_s20 = smov (%p27_p3, %s873_s20), 0  ;;  %p780_p6 = por %p115_p4, %p62_p1 }
   0xb   : > { %s50_s24 = ssub.s32 %s703_s17, %s875_s20  ;;  %s55_s26 = sadd.s32 1, %s687_s13 }
   0xc   : > { %s52_s25 = sor.u32 %s51_s22, %s50_s24  ;;  %p534_p8 = scmp.ge.s32.totalorder %s707_s18, 4 }
   0xd   : > { %p53_p7 = scmp.eq.s32.totalorder %s52_s25, 0 }
   0xe   : > { %143 = sbr.rel (%p534_p8) target bundleno = 37 (0x25), region = 24 }
   0xf   : > { %s788_s27 = scalar_select %p53_p7, %s687_s13, %s55_s26  }
  0x15   : > { %146 = sbr.rel (!%p64_p5) target bundleno = 37 (0x25), region = 28  ;;  %s148_s28 = sand.u32 (%p64_p5), 1, %s687_s13  }
  0x16   : > { %s536_s29 = sshll.u32 (%p64_p5), %s703_s17, 5  ;;  %s535_s30 = sshll.u32 (%p64_p5), %s148_s28, 6 }
  0x17   : > { %s152_s4 = sadd.s32 (%p64_p5), %s699_s16, %s536_s29  ;;  %s150_s9 = scalar_lea.vmem (%p64_p5), [#allocation2], %s535_s30 }
  0x18   : > { %s537_s5 = sshll.u32 (%p64_p5), %s152_s4, 2 }
  0x19   : > { %s797_s8 = scalar_lea.vmem (%p64_p5), %s860_s1, %s537_s5 }
  0x1a   : > { %v170_v0 = vld [vmem:[%s797_s8] sm:$0xf] (%p64_p5)  ;;  %v172_v1 = vld [vmem:[%s797_s8 + $0x8] sm:$0xf] (%p64_p5)  ;;  %v174_v2 = vld [vmem:[%s797_s8 + $0x10] sm:$0xf] (%p64_p5) }
  0x1b   : > { %171 = vst [vmem:[%s150_s9] sm:$0xf] (%p64_p5), %v170_v0  ;;  %173 = vst [vmem:[%s150_s9 + $0x4] sm:$0xf] (%p64_p5), %v172_v1  ;;  %v176_v3 = vld [vmem:[%s797_s8 + $0x18] sm:$0xf] (%p64_p5) }
  0x1c   : > { %175 = vst [vmem:[%s150_s9 + $0x8] sm:$0xf] %v174_v2  ;;  %v178_v4 = vld [vmem:[%s797_s8 + $0x20] sm:$0xf]  ;;  %v180_v5 = vld [vmem:[%s797_s8 + $0x28] sm:$0xf] }
  0x1d   : > { %177 = vst [vmem:[%s150_s9 + $0xc] sm:$0xf] %v176_v3  ;;  %179 = vst [vmem:[%s150_s9 + $0x10] sm:$0xf] %v178_v4  ;;  %v182_v6 = vld [vmem:[%s797_s8 + $0x30] sm:$0xf] }
  0x1e   : > { %181 = vst [vmem:[%s150_s9 + $0x14] sm:$0xf] %v180_v5  ;;  %v184_v7 = vld [vmem:[%s797_s8 + $0x38] sm:$0xf]  ;;  %v186_v8 = vld [vmem:[%s797_s8 + $0x40] sm:$0xf] }
  0x1f   : > { %183 = vst [vmem:[%s150_s9 + $0x18] sm:$0xf] %v182_v6  ;;  %185 = vst [vmem:[%s150_s9 + $0x1c] sm:$0xf] %v184_v7  ;;  %v188_v9 = vld [vmem:[%s797_s8 + $0x48] sm:$0xf] }
  0x20   : > { %187 = vst [vmem:[%s150_s9 + $0x20] sm:$0xf] %v186_v8  ;;  %v190_v10 = vld [vmem:[%s797_s8 + $0x50] sm:$0xf]  ;;  %v192_v11 = vld [vmem:[%s797_s8 + $0x58] sm:$0xf] }
  0x21   : > { %189 = vst [vmem:[%s150_s9 + $0x24] sm:$0xf] %v188_v9  ;;  %191 = vst [vmem:[%s150_s9 + $0x28] sm:$0xf] %v190_v10  ;;  %v194_v12 = vld [vmem:[%s797_s8 + $0x60] sm:$0xf] }
  0x22   : > { %193 = vst [vmem:[%s150_s9 + $0x2c] sm:$0xf] %v192_v11  ;;  %v196_v13 = vld [vmem:[%s797_s8 + $0x68] sm:$0xf]  ;;  %v198_v14 = vld [vmem:[%s797_s8 + $0x70] sm:$0xf] }
  0x23   : > { %195 = vst [vmem:[%s150_s9 + $0x30] sm:$0xf] %v194_v12  ;;  %197 = vst [vmem:[%s150_s9 + $0x34] sm:$0xf] %v196_v13  ;;  %v200_v15 = vld [vmem:[%s797_s8 + $0x78] sm:$0xf] }
  0x24   : > { %199 = vst [vmem:[%s150_s9 + $0x38] sm:$0xf] %v198_v14  ;;  %201 = vst [vmem:[%s150_s9 + $0x3c] sm:$0xf] %v200_v15 }
  0x25 PF: > { %p538_p9 = scmp.ge.s32.totalorder %s707_s18, 1  ;;  %p255_p10 = scmp.lt.s32.totalorder %s707_s18, 5 }
  0x27   : > { %p256_p11 = pnand %p538_p9, %p255_p10 }
  0x28   : > { %s262_s10 = sand.u32 (!%p256_p11), 1, %s683_s12   ;;  %v709_v16 = vmov (!%p256_p11), 0.0   ;;  %vm710_vm0 = vmmov (!%p256_p11), 0   ;;  %v303_v17 = vld [vmem:[%s861_s2] sm:$0xff] (!%p256_p11)  ;;  %v711_v18 = vmov (!%p256_p11), 0   ;;  %v304_v20 = vld [vmem:[%s861_s2 + $0x8] sm:$0xff] (!%p256_p11) }
  0x29   : > { %259 = sbr.rel (%p256_p11) target bundleno = 300 (0x12c), region = 69  ;;  %564 = vmatprep.subr.bf16.mxu0 (!%p256_p11), %v709_v16  ;;  %s539_s11 = sshll.u32 (!%p256_p11), %s262_s10, 6  ;;  %580 = vmatprep.mubr.msk.bf16.mxu0 (!%p256_p11), %vm710_vm0, %v709_v16  ;;  %v652_v28 = vld [vmem:[%s859_s0] sm:$0xff] (!%p256_p11)  }
  0x2a   : > { %643 = vset.pattern.permute.xlu0 (!%p256_p11), %v711_v18  ;;  %s264_s24 = scalar_lea.vmem (!%p256_p11), [#allocation2], %s539_s11  ;;  %s540_s30 = sshll.u32 (!%p256_p11), %s262_s10, 4 }
  0x2b   : > { %v644_v19 = vld [vmem:[%s264_s24] sm:$0xff] (!%p256_p11)   ;;  %307 = vperm.xlu0 (!%p256_p11), %643, %v303_v17   ;;  %v645_v21 = vld [vmem:[%s264_s24 + $0x8] sm:$0xff] (!%p256_p11)   ;;  %v646_v22 = vld [vmem:[%s264_s24 + $0x10] sm:$0xff] (!%p256_p11)   ;;  %s283_s4 = scalar_lea.vmem (!%p256_p11), [#allocation3], %s540_s30 }
  0x2c   : > { %565 = vmatpush3.bf16.msra.mxu0 (!%p256_p11), %v644_v19  ;;  %v647_v23 = vld [vmem:[%s264_s24 + $0x18] sm:$0xff] (!%p256_p11)   ;;  %v648_v24 = vld [vmem:[%s264_s24 + $0x20] sm:$0xff] (!%p256_p11)   ;;  %v649_v25 = vld [vmem:[%s264_s24 + $0x28] sm:$0xff] (!%p256_p11)  }
  0x2d   : > { %566 = vmatprep.subr.bf16.mxu0 (!%p256_p11), %v709_v16  ;;  %v650_v26 = vld [vmem:[%s264_s24 + $0x30] sm:$0xff] (!%p256_p11)   ;;  %v651_v27 = vld [vmem:[%s264_s24 + $0x38] sm:$0xff] (!%p256_p11)  }
  0x2f   : > { %312 = vperm.xlu0 (!%p256_p11), %643, %v304_v20  }
  0x30   : > { %567 = vmatpush3.bf16.msra.mxu0 %v645_v21  ;;  %s551_s5 = sshll.u32 (%p780_p6), %s695_s15, 2 }
  0x31   : > { %568 = vmatprep.subr.bf16.mxu0 %v709_v16  ;;  %s420_s6 = sadd.s32 (%p780_p6), %s691_s14, %s551_s5 }
  0x32   : > { %s552_s12 = sshll.u32 (%p780_p6), %s420_s6, 3 }
  0x33   : > { %s422_s9 = scalar_lea.vmem (%p780_p6), %s862_s3, %s552_s12 }
  0x34   : > { %569 = vmatpush3.bf16.msra.mxu0 %v646_v22 }
  0x35   : > { %570 = vmatprep.subr.bf16.mxu0 %v709_v16 }
  0x38   : > { %571 = vmatpush3.bf16.msra.mxu0 %v647_v23 }
  0x39   : > { %572 = vmatprep.subr.bf16.mxu0 %v709_v16 }
  0x3c   : > { %573 = vmatpush3.bf16.msra.mxu0 %v648_v24 }
  0x3d   : > { %574 = vmatprep.subr.bf16.mxu0 %v709_v16 }
  0x40   : > { %575 = vmatpush3.bf16.msra.mxu0 %v649_v25 }
  0x41   : > { %576 = vmatprep.subr.bf16.mxu0 %v709_v16 }
  0x44   : > { %577 = vmatpush3.bf16.msra.mxu0 %v650_v26 }
  0x45   : > { %578 = vmatprep.subr.bf16.mxu0 %v709_v16 }
  0x48   : > { %579 = vmatpush3.bf16.msra.mxu0 %v651_v27 }
  0x4b   : > { %581 = vmatmul.mubr.bf16.vlgmr.msra.gmra.mrb[0].mxu0 %v652_v28 }
  0xaa   : > { %v308_v29 = vpop.permute.xlu0 %307 }
  0xae   : > { %v313_v33 = vpop.permute.xlu0 %312 }
 0x11d   : > { %418 = sbr.rel (!%p780_p6) target bundleno = 300 (0x12c), region = 77 }
 0x11e   : > { %v403_v30 = vpop.f32.mrb[0].mxu0 }
 0x11f   : > { %v404_v31 = vadd.f32 %v403_v30, %v308_v29  ;;  %v582_v32 = vpop.f32.mrb[1].mxu0 }
 0x120   : > { %v406_v34 = vpop.f32.mrb[2].mxu0 }
 0x121   : > { %410 = vst [vmem:[%s283_s4] sm:$0xff] %v404_v31  ;;  %v407_v35 = vadd.f32 %v406_v34, %v313_v33  ;;  %v583_v36 = vpop.f32.mrb[3].mxu0 }
 0x123   : > { %411 = vst [vmem:[%s283_s4 + $0x8] sm:$0xff] %v407_v35 }
 0x128   : > { %v452_v37 = vld [vmem:[%s283_s4] sm:$0xff] }
 0x129   : > { %453 = vst [vmem:[%s422_s9] sm:$0xff] %v452_v37 }
 0x12a   : > { %v454_v38 = vld [vmem:[%s283_s4 + $0x8] sm:$0xff] }
 0x12b   : > { %455 = vst [vmem:[%s422_s9 + $0x10] sm:$0xff] %v454_v38 }
 0x12c PF: > { %s13_s18 = sadd.s32 1, %s707_s18   ;;  %s864_s12 = smov %s687_s13 }
 0x12d   : > { %p10_p12 = scmp.ge.s32.totalorder %s13_s18, 6   ;;  %s865_s13 = smov %s788_s27 }
 0x12e   : > { %s866_s14 = smov %s699_s16  ;;  %s867_s15 = smov %s703_s17 }
 0x12f   : > { %s868_s16 = smov %s871_s19  ;;  %s869_s17 = smov %s875_s20 }
 0x130   :  { %12 = sbr.rel (!%p10_p12) target bundleno = 4 (0x4), region = 146 }

</bundles_post_ra>
